<compile_context>
chip_gen: v7x
topology: tpu7x:2x2x1
jax: 0.10.0
libtpu: 0.0.40
codegen_flags: <defaults>
</compile_context>

<pallas_src>
import functools

import jax
import jax.numpy as jnp
from jax.experimental import pallas as pl
from jax.experimental.pallas import tpu as pltpu


def _focal_loss_kernel(logits_ref, targets_ref, out_ref, *,
                       alpha, gamma, n_valid, tile_n):
    # logits_ref : (TILE_N, C) native dtype in VMEM
    # targets_ref: (TILE_N, 1) int32 in VMEM
    # out_ref    : (1, 1) f32 in SMEM  -> per-tile partial sum of focal losses
    x = logits_ref[...].astype(jnp.float32)                 # (TILE_N, C)
    t = targets_ref[...]                                    # (TILE_N, 1)

    # Numerically stable softmax pieces (single exp over the row).
    m = jnp.max(x, axis=-1, keepdims=True)                  # (TILE_N, 1)
    xm = x - m                                              # (TILE_N, C)
    e = jnp.exp(xm)                                         # (TILE_N, C)  EUP
    s = jnp.sum(e, axis=-1, keepdims=True)                  # (TILE_N, 1)

    # Target-class gather via one-hot select (no dynamic gather on TPU).
    col = jax.lax.broadcasted_iota(jnp.int32, x.shape, 1)   # (TILE_N, C)
    tgt_shift = jnp.sum(jnp.where(col == t, xm, 0.0), axis=-1, keepdims=True)

    # Per-example cross entropy (reduction='none'); pt = exp(-ce) is a cheap
    # per-row EUP op (much cheaper than a second masked (TILE_N, C) reduce).
    ce = jnp.maximum(jnp.log(s) - tgt_shift, 0.0)           # ce >= 0
    pt = jnp.exp(-ce)                                       # pt in (0, 1]
    one_minus_pt = 1.0 - pt

    # (1 - pt) ** gamma: multiply chain for small integer gamma (avoids the
    # exp/log float-pow and its NaN hazard).
    g = float(gamma)
    if g == int(g) and 0 <= int(g) <= 8:
        mod = jnp.ones_like(one_minus_pt)
        for _ in range(int(g)):
            mod = mod * one_minus_pt
    else:
        mod = jnp.power(jnp.maximum(one_minus_pt, 0.0), g)

    # TODO(synk): scalar alpha only (matches the reference module); per-class
    # alpha_t weighting would need an alpha vector input.
    focal = alpha * mod * ce                                 # (TILE_N, 1)

    # Mask rows past the true batch size (the ragged last block reads
    # unspecified values past the array edge).
    row = (pl.program_id(0) * tile_n
           + jax.lax.broadcasted_iota(jnp.int32, focal.shape, 0))
    focal = jnp.where(row < n_valid, focal, 0.0)

    out_ref[0, 0] = jnp.sum(focal)


def _vmem_limit_bytes():
    cap = 64 << 20
    try:
        cap = int(pltpu.get_tpu_info().vmem_capacity_bytes)
    except Exception:
        pass
    # Never request the whole physical VMEM (leave compiler-scratch headroom):
    # v7x (64 MiB) -> ~48 MiB; v5e/v6e (128 MiB) -> ~96 MiB.
    return max(32 << 20, min((cap * 3) // 4, 100 << 20))


def _choose_tiling(n, c, vmem_limit):
    # Budget for ONE logits block, counted at f32 width (in-kernel temporaries
    # are f32 even for bf16 inputs). The BlockSpec double-buffers the
    # native-width block and a few f32 temporaries live alongside it, so keep
    # the per-block budget well under the scoped-VMEM limit.
    budget = max(2 << 20, min(12 << 20, vmem_limit // 8))
    rows = budget // max(1, 4 * c)
    rows = max(128, min(8192, (rows // 128) * 128))   # 128-row multiples:
    # sublane-aligned for f32/bf16/int8 and keeps blocks big enough to
    # amortize the ~0.35us per-grid-step overhead.
    # Prefer >= 2 grid steps: pipelining + v7x has 2 TensorCores ('parallel').
    half = ((pl.cdiv(n, 2) + 127) // 128) * 128
    tile = min(rows, half)
    if tile >= n:
        return n, 1        # one full-array block: no padding, no constraint
    return tile, pl.cdiv(n, tile)


def focal_loss(logits, targets, alpha=1.0, gamma=2.0, tile_n=None):
    """logits: (N, C) float; targets: (N,) int class indices. Returns scalar f32."""
    n, c = logits.shape
    vmem_limit = _vmem_limit_bytes()

    if tile_n is None:
        tile_n, num_tiles = _choose_tiling(n, c, vmem_limit)
    else:
        tile_n = int(tile_n)
        if tile_n >= n:
            tile_n, num_tiles = n, 1
        else:
            tile_n = max(128, (tile_n // 128) * 128)   # keep (8,128)-legal
            num_tiles = pl.cdiv(n, tile_n)

    targets_2d = targets.astype(jnp.int32).reshape(n, 1)

    kernel = functools.partial(
        _focal_loss_kernel,
        alpha=float(alpha), gamma=float(gamma), n_valid=n, tile_n=tile_n)

    itemsize = int(logits.dtype.itemsize)
    cost = pl.CostEstimate(
        flops=int(7 * n * c),
        transcendentals=int(n * c + 2 * n),
        bytes_accessed=int(n * c * itemsize + n * 4 + num_tiles * 4),
    )

    partial_sums = pl.pallas_call(
        kernel,
        out_shape=jax.ShapeDtypeStruct((num_tiles, 1), jnp.float32),
        grid=(num_tiles,),
        in_specs=[
            pl.BlockSpec((tile_n, c), lambda i: (i, 0)),   # native-dtype DMA
            pl.BlockSpec((tile_n, 1), lambda i: (i, 0)),
        ],
        out_specs=pl.BlockSpec((1, 1), lambda i: (i, 0),
                               memory_space=pltpu.MemorySpace.SMEM),
        compiler_params=pltpu.CompilerParams(
            dimension_semantics=("parallel",),
            vmem_limit_bytes=int(vmem_limit),
        ),
        cost_estimate=cost,
    )(logits, targets_2d)

    # Final mean: just num_tiles scalars to reduce in XLA.
    return jnp.sum(partial_sums) / jnp.float32(n)


def _focal_loss_ref(logits, targets, alpha=1.0, gamma=2.0):
    # Pure-JAX reference mirroring F.cross_entropy + focal transform.
    logp = jax.nn.log_softmax(logits.astype(jnp.float32), axis=-1)
    ce = -jnp.take_along_axis(logp, targets[:, None].astype(jnp.int32), axis=-1)[:, 0]
    pt = jnp.exp(-ce)
    return jnp.mean(alpha * (1.0 - pt) ** gamma * ce)


if __name__ == "__main__":
    key = jax.random.PRNGKey(0)
    k1, k2, k3, k4 = jax.random.split(key, 4)

    # Case 1: small batch -> single full-array tile path.
    N1, C1 = 8, 32
    logits1 = jax.random.normal(k1, (N1, C1), dtype=jnp.float32)
    targets1 = jax.random.randint(k2, (N1,), 0, C1, dtype=jnp.int32)
    loss1 = jax.block_until_ready(focal_loss(logits1, targets1, alpha=1.0, gamma=2.0))
    ref1 = _focal_loss_ref(logits1, targets1, alpha=1.0, gamma=2.0)
    assert jnp.allclose(loss1, ref1, rtol=1e-5, atol=1e-5), (loss1, ref1)

    # Case 2: multi-tile path with a ragged last block (in-kernel row masking).
    N2, C2 = 300, 40
    logits2 = jax.random.normal(k3, (N2, C2), dtype=jnp.float32)
    targets2 = jax.random.randint(k4, (N2,), 0, C2, dtype=jnp.int32)
    loss2 = jax.block_until_ready(focal_loss(logits2, targets2, alpha=0.5, gamma=2.0))
    ref2 = _focal_loss_ref(logits2, targets2, alpha=0.5, gamma=2.0)
    assert jnp.allclose(loss2, ref2, rtol=1e-5, atol=1e-5), (loss2, ref2)

    print("KERNEL_OK")
</pallas_src>

<mosaic_0001>
module attributes {stable_mosaic.version = 11 : i64} {
  func.func @_focal_loss_kernel(%arg0: i32, %arg1: memref<8x32xf32, #tpu.memory_space<vmem>>, %arg2: memref<8x1xi32, #tpu.memory_space<vmem>>, %arg3: memref<1x1xf32, #tpu.memory_space<smem>>) attributes {dimension_semantics = [#tpu.dimension_semantics<parallel>], iteration_bounds = array<i64: 1>, scalar_prefetch = 0 : i64, scratch_operands = 0 : i64, tpu.core_type = #tpu.core_type<tc>, window_params = [{transform_indices = @transform_0, window_bounds = array<i64: 8, 32>}, {transform_indices = @transform_1, window_bounds = array<i64: 8, 1>}, {transform_indices = @transform_2, window_bounds = array<i64: 1, 1>}]} {
    %c0 = arith.constant 0 : index
    %c0_0 = arith.constant 0 : index
    %0 = vector.load %arg1[%c0, %c0_0] : memref<8x32xf32, #tpu.memory_space<vmem>>, vector<8x32xf32>
    %c0_1 = arith.constant 0 : index
    %c0_2 = arith.constant 0 : index
    %1 = vector.load %arg2[%c0_1, %c0_2] : memref<8x1xi32, #tpu.memory_space<vmem>>, vector<8x1xi32>
    %cst = arith.constant dense<0xFF800000> : vector<8xf32>
    %2 = vector.multi_reduction <maximumf>, %0, %cst [1] : vector<8x32xf32> to vector<8xf32>
    %3 = vector.shape_cast %2 : vector<8xf32> to vector<8x1xf32>
    %4 = vector.broadcast %3 : vector<8x1xf32> to vector<8x32xf32>
    %5 = arith.subf %0, %4 : vector<8x32xf32>
    %6 = math.exp %5 : vector<8x32xf32>
    %cst_3 = arith.constant dense<0.000000e+00> : vector<8xf32>
    %7 = vector.multi_reduction <add>, %6, %cst_3 [1] : vector<8x32xf32> to vector<8xf32>
    %8 = vector.shape_cast %7 : vector<8xf32> to vector<8x1xf32>
    %9 = tpu.iota {dimensions = array<i32: 1>} : vector<8x32xi32>
    %10 = vector.broadcast %1 : vector<8x1xi32> to vector<8x32xi32>
    %11 = arith.cmpi eq, %9, %10 : vector<8x32xi32>
    %cst_4 = arith.constant 0.000000e+00 : f32
    %12 = vector.broadcast %cst_4 : f32 to vector<8x32xf32>
    %13 = arith.select %11, %5, %12 : vector<8x32xi1>, vector<8x32xf32>
    %cst_5 = arith.constant dense<0.000000e+00> : vector<8xf32>
    %14 = vector.multi_reduction <add>, %13, %cst_5 [1] : vector<8x32xf32> to vector<8xf32>
    %15 = vector.shape_cast %14 : vector<8xf32> to vector<8x1xf32>
    %16 = math.log %8 : vector<8x1xf32>
    %17 = arith.subf %16, %15 : vector<8x1xf32>
    %cst_6 = arith.constant 0.000000e+00 : f32
    %18 = vector.broadcast %cst_6 : f32 to vector<8x1xf32>
    %19 = arith.maximumf %17, %18 : vector<8x1xf32>
    %cst_7 = arith.constant 0.000000e+00 : f32
    %20 = vector.broadcast %cst_7 : f32 to vector<8x1xf32>
    %21 = arith.subf %20, %19 : vector<8x1xf32>
    %22 = math.exp %21 : vector<8x1xf32>
    %cst_8 = arith.constant 1.000000e+00 : f32
    %23 = vector.broadcast %cst_8 : f32 to vector<8x1xf32>
    %24 = arith.subf %23, %22 : vector<8x1xf32>
    %cst_9 = arith.constant 1.000000e+00 : f32
    %25 = vector.broadcast %cst_9 : f32 to vector<8x1xf32>
    %26 = arith.mulf %25, %24 : vector<8x1xf32>
    %27 = arith.mulf %26, %24 : vector<8x1xf32>
    %cst_10 = arith.constant 1.000000e+00 : f32
    %28 = vector.broadcast %cst_10 : f32 to vector<8x1xf32>
    %29 = arith.mulf %28, %27 : vector<8x1xf32>
    %30 = arith.mulf %29, %19 : vector<8x1xf32>
    %c8_i32 = arith.constant 8 : i32
    %31 = arith.muli %arg0, %c8_i32 : i32
    %32 = tpu.iota {dimensions = array<i32: 0>} : vector<8x1xi32>
    %33 = vector.broadcast %31 : i32 to vector<8x1xi32>
    %34 = arith.addi %33, %32 : vector<8x1xi32>
    %c8_i32_11 = arith.constant 8 : i32
    %35 = vector.broadcast %c8_i32_11 : i32 to vector<8x1xi32>
    %36 = arith.cmpi slt, %34, %35 : vector<8x1xi32>
    %cst_12 = arith.constant 0.000000e+00 : f32
    %37 = vector.broadcast %cst_12 : f32 to vector<8x1xf32>
    %38 = arith.select %36, %30, %37 : vector<8x1xi1>, vector<8x1xf32>
    %39 = vector.shape_cast %38 : vector<8x1xf32> to vector<1x8x1xf32>
    %cst_13 = arith.constant dense<0.000000e+00> : vector<1xf32>
    %40 = vector.multi_reduction <add>, %39, %cst_13 [1, 2] : vector<1x8x1xf32> to vector<1xf32>
    %41 = vector.shape_cast %40 : vector<1xf32> to vector<1x1x1xf32>
    %42 = vector.extract %41[0, 0, 0] : f32 from vector<1x1x1xf32>
    %c0_14 = arith.constant 0 : index
    %c0_15 = arith.constant 0 : index
    %43 = memref.load %arg3[%c0_14, %c0_15] : memref<1x1xf32, #tpu.memory_space<smem>>
    memref.store %42, %arg3[%c0_14, %c0_15] : memref<1x1xf32, #tpu.memory_space<smem>>
    return
  }
  func.func @transform_0(%arg0: i32) -> (i32, i32) {
    %c0_i32 = arith.constant 0 : i32
    %c0_i32_0 = arith.constant 0 : i32
    return %arg0, %c0_i32 : i32, i32
  }
  func.func @transform_1(%arg0: i32) -> (i32, i32) {
    %c0_i32 = arith.constant 0 : i32
    %c0_i32_0 = arith.constant 0 : i32
    return %arg0, %c0_i32 : i32, i32
  }
  func.func @transform_2(%arg0: i32) -> (i32, i32) {
    %c0_i32 = arith.constant 0 : i32
    %c0_i32_0 = arith.constant 0 : i32
    return %arg0, %c0_i32 : i32, i32
  }
}

</mosaic_0001>

<bundles_post_ra>
// kernel: tpu_custom_call.1
= control target key start
LH: loop header
LB: loop body
LE: loop exit
PB: predicated region body
PF: predicated region fallthrough
CT: control target
= control target key end

     0   :  { %vm14_vm0 = vcmask 261120   ;;  %s138_s0 = inlined_call_operand.vmem [shape: f32[8,32], index: 0, kind: input, shape index: {}]   ;;  %s139_s1 = inlined_call_operand.vmem [shape: s32[8,1], index: 1, kind: input, shape index: {}]   ;;  %s140_s2 = inlined_call_operand.hbm [shape: f32[1,1], index: 2, kind: output, shape index: {}]  }
   0x1   :  { %v12_v0 = vld [vmem:[%s138_s0] sm:$0xff] }
   0x2   :  { %7 = vsyncpa [#allocation3], 0  ;;  %v15_v1 = vsel %vm14_vm0, %v12_v0, -inf  ;;  %v100_v2 = vmov 0   ;;  %v13_v3 = vld [vmem:[%s139_s1] sm:$0xff]  ;;  %v24_v7 = vlaneseq  ;;  %vm51_vm2 = vcmask 7168  }
   0x3   :  { %81 = vset.pattern.permute.xlu0 %v100_v2  ;;  %s88_s14 = scalar_lea.hbm %s140_s2, 16 }
   0x4   :  { %16 = vmax.xlane.f32.xlu0 %v15_v1  ;;  %v25_v8 = vand.u32 127, %v24_v7  ;;  %p89_p0 = scmp.ne.s32.totalorder %s140_s2, %s88_s14  ;;  %p92_p1 = scmp.lt.u32.totalorder %s88_s14, %s140_s2 }
   0x6   :  { %p94_p2 = pnand %p92_p1, %p89_p0 }
  0x1a   :  { %27 = vperm.xlu0 %81, %v13_v3  }
  0x91   :  { %v17_v4 = vpop.xlane.xlu0 %16 }
  0x92   :  { %v18_v5 = vsub.f32 %v12_v0, %v17_v4 }
  0x94   :  { %v19_v6 = vmul.f32 1.442695, %v18_v5 }
  0x96   :  { %82 = vpow2.f32 %v19_v6 }
  0x99   :  { %v28_v9 = vpop.permute.xlu0 %27 }
  0x9a   :  { %vm29_vm1 = vcmp.eq.s32.totalorder %v25_v8, %v28_v9 }
  0x9b   :  { %v30_v12 = vsel %vm29_vm1, %v18_v5, 0.0 }
  0x9c   :  { %v31_v13 = vsel %vm14_vm0, %v30_v12, 0.0 }
  0xa0   :  { %v83_v10 = vpop.eup %82 }
  0xa1   :  { %v21_v11 = vsel %vm14_vm0, %v83_v10, 0.0 }
  0xa2   :  { %22 = vadd.xlane.f32.xlu1 %v21_v11 }
  0xa6   :  { %32 = vadd.xlane.f32.xlu1 %v31_v13 }
 0x12f   :  { %v23_v14 = vpop.xlane.xlu1 %22 }
 0x130   :  { %84 = vlog2.f32 %v23_v14 }
 0x133   :  { %v33_v17 = vpop.xlane.xlu1 %32 }
 0x13a   :  { %v85_v15 = vpop.eup %84 }
 0x13b   :  { %v35_v16 = vmul.f32 0.6931472, %v85_v15 }
 0x13d   :  { %v36_v18 = vsub.f32 %v35_v16, %v33_v17 }
 0x13f   :  { %v37_v19 = vmax.f32 %v36_v18, 0.0 }
 0x141   :  { %v38_v20 = vsub.f32 0.0, %v37_v19 }
 0x143   :  { %v39_v21 = vmul.f32 1.442695, %v38_v20 }
 0x145   :  { %86 = vpow2.f32 %v39_v21 }
 0x14f   :  { %v87_v22 = vpop.eup %86 }
 0x150   :  { %v41_v23 = vsub.f32 1.0, %v87_v22 }
 0x152   :  { %v42_v24 = vmul.f32 %v41_v23, %v41_v23 }
 0x154   :  { %v43_v25 = vmul.f32 %v42_v24, %v37_v19 }
 0x156   :  { %v52_v26 = vsel %vm51_vm2, %v43_v25, 0.0 }
 0x157   :  { %53 = vadd.xlane.f32.xlu1 %v52_v26 }
 0x1e4   :  { %v54_v27 = vpop.xlane.xlu1 %53 }
 0x1e5   :  { %v55_v28 = vrot.slane %v54_v27, 4 }
 0x1e7   :  { %v56_v29 = vadd.f32 %v55_v28, %v54_v27 }
 0x1e9   :  { %v57_v30 = vrot.slane %v56_v29, 2 }
 0x1eb   :  { %v58_v31 = vadd.f32 %v57_v30, %v56_v29 }
 0x1ed   :  { %v59_v32 = vrot.slane %v58_v31, 1 }
 0x1ef   :  { %v60_v33 = vadd.f32 %v59_v32, %v58_v31 }
 0x1f1   :  { %77 = vpush %v60_v33 }
 0x222   :  { %s78_s0 = spop %77 }
 0x223   :  { %63 = sst [smem:[#allocation2]] %s78_s0 }
 0x224   :  { %97 = shalt.err (!%p94_p2)
}
 0x225   :  { %s101_s19 = smov [#allocation2]  }
 0x226   :  { %71 = dma.smem_to_hbm %s101_s19, 16, %s140_s2, [#allocation3]  }
 0x227   :  { %98 = dma.done.wait [#allocation3], 16  }
 0x228   :  { %99 = vsyncadd [#allocation3], 4294967280 }
 0x229   :  { %75 = sfence }
 0x22a   :  { %76 = vsyncpa [#allocation3], 1 }

</bundles_post_ra>
